<compile_context>
chip_gen: v7x
topology: tpu7x:2x2x1
jax: 0.10.0
libtpu: 0.0.40
codegen_flags: <defaults>
</compile_context>

<pallas_src>
import jax
import jax.numpy as jnp
from jax.experimental import pallas as pl
from jax.experimental.pallas import tpu as pltpu

LANE = 128


def _kf_scan_kernel(x0_ref, u_seq_ref, k7_ref, w_ref, xs_ref, zs_ref, state_ref):
    """One Kalman-filter estimator step per grid iteration; weights stay resident."""
    t = pl.program_id(0)

    @pl.when(t == 0)
    def _init():
        B, L2 = x0_ref.shape
        # state = [u_t_1 | g_t_1 | 0 ... 0 | 1]; the trailing 1 carries the folded biases.
        state_ref[...] = jnp.concatenate(
            [x0_ref[...],
             jnp.zeros((B, LANE - L2 - 1), jnp.float32),
             jnp.ones((B, 1), jnp.float32)], axis=-1)

    w_s = w_ref[:LANE, :]      # state transition + folded (k5(u)+w, u) biases + 1-lane keepalive
    w_z = w_ref[LANE:, :]      # block-diag (h1, h4) + folded (h1_b, h4_b) biases

    # x = [u_t | g_t | 0...0 | 1]; the k7(u_t_0) term enters via the tiny streamed matmul.
    x = (jnp.dot(state_ref[...], w_s, preferred_element_type=jnp.float32)
         + jnp.dot(u_seq_ref[0], k7_ref[...], preferred_element_type=jnp.float32))
    # z = [u_z | g_z | 0...0]
    z = jnp.dot(x, w_z, preferred_element_type=jnp.float32)

    state_ref[...] = x
    xs_ref[0] = x
    zs_ref[0] = z


def prepare_params(params):
    """One-time host packing: fused (256,128) weight slab, biases folded into row 127."""
    L = params["k1_w"].shape[0]
    assert 3 * L < LANE, "packed layout requires 3*layer_num + 1 <= 128"
    BIAS = LANE - 1
    f32 = lambda a: jnp.asarray(a, jnp.float32)

    bias_u = (f32(params["u"]) @ f32(params["k5_w"]).T)[0] + f32(params["w"])  # k5(u) + w
    bias_g = f32(params["u"])[0]                                               # u

    w = jnp.zeros((2 * LANE, LANE), jnp.float32)
    # --- W_s (rows 0:128): [u_t_1 | g_t_1 | ... | 1] -> [u_t | g_t | 0 | 1] ---
    w = w.at[0:L, 0:L].set(f32(params["k1_w"]).T)                        # k1(u_t_1)
    w = w.at[L:2 * L, 0:L].set(f32(params["k2_w"]).T)                    # k2(g_t_1)
    w = w.at[L:2 * L, L:2 * L].set(jnp.eye(L, dtype=jnp.float32))        # g_t_1 passthrough
    w = w.at[BIAS, 0:L].set(bias_u)                                      # folded u_t bias
    w = w.at[BIAS, L:2 * L].set(bias_g)                                  # folded g_t bias
    w = w.at[BIAS, BIAS].set(1.0)                                        # keep 1-lane alive
    # --- W_z (rows 128:256): [u_t | g_t | ... | 1] -> [u_z | g_z | 0] ---
    w = w.at[LANE + 0:LANE + L, 0:L].set(f32(params["h1_w"]).T)
    w = w.at[LANE + L:LANE + 2 * L, L:2 * L].set(f32(params["h4_w"]).T)
    w = w.at[LANE + BIAS, 0:L].set(f32(params["h1_b"]))
    w = w.at[LANE + BIAS, L:2 * L].set(f32(params["h4_b"]))

    # k7 alone as (L, 128): u_t_0 is streamed raw, its contribution lands in lanes L:2L.
    k7_pack = jnp.zeros((L, LANE), jnp.float32)
    k7_pack = k7_pack.at[:, L:2 * L].set(f32(params["k7_w"]).T)

    return {"w_pack": w, "k7_pack": k7_pack, "L": L}


def _kf_pallas_scan(x_0, u_seq, prepared):
    """T estimator steps inside ONE pallas_call; returns padded lane-dense outputs."""
    L = prepared["L"]
    T, B, _ = u_seq.shape
    return pl.pallas_call(
        _kf_scan_kernel,
        grid=(T,),
        out_shape=[jax.ShapeDtypeStruct((T, B, LANE), jnp.float32)] * 2,
        in_specs=[pl.BlockSpec((B, 2 * L), lambda t: (0, 0)),          # x_0 (resident)
                  pl.BlockSpec((1, B, L), lambda t: (t, 0, 0)),        # u_t_0 stream
                  pl.BlockSpec((L, LANE), lambda t: (0, 0)),           # k7 (resident)
                  pl.BlockSpec((2 * LANE, LANE), lambda t: (0, 0))],   # W_s/W_z (resident)
        out_specs=[pl.BlockSpec((1, B, LANE), lambda t: (t, 0, 0))] * 2,
        scratch_shapes=[pltpu.VMEM((B, LANE), jnp.float32)],           # carried state
        compiler_params=pltpu.CompilerParams(dimension_semantics=("arbitrary",)),
    )(x_0.astype(jnp.float32), u_seq.astype(jnp.float32),
      prepared["k7_pack"], prepared["w_pack"])


def kalman_filter_estimator_forward(x_t_1, u_t_0, prepared):
    """Single module-equivalent forward step: returns (x_t, z_t), each (B, 2*layer_num)."""
    L = prepared["L"]
    xs, zs = _kf_pallas_scan(x_t_1, u_t_0[None], prepared)
    return xs[0, :, :2 * L], zs[0, :, :2 * L]


def kalman_filter_estimator_scan(x_0, u_seq, prepared):
    """T forward steps fused into one kernel launch: returns (x_seq, z_seq), (T, B, 2*L)."""
    L = prepared["L"]
    xs, zs = _kf_pallas_scan(x_0, u_seq, prepared)
    return xs[:, :, :2 * L], zs[:, :, :2 * L]


def _reference_forward(x_t_1, u_t_0, p):
    L = x_t_1.shape[1] // 2
    u_t_1 = x_t_1[:, :L]
    g_t_1 = x_t_1[:, L:]
    g_t = g_t_1 + p["u"] + u_t_0 @ p["k7_w"].T
    u_t = (u_t_1 @ p["k1_w"].T + g_t_1 @ p["k2_w"].T
           + p["u"] @ p["k5_w"].T + p["w"])
    u_z = u_t @ p["h1_w"].T + p["h1_b"]
    g_z = g_t @ p["h4_w"].T + p["h4_b"]
    return (jnp.concatenate([u_t, g_t], axis=1),
            jnp.concatenate([u_z, g_z], axis=1))


def _reference_scan(x_0, u_seq, p):
    xs, zs = [], []
    x = x_0
    for t in range(u_seq.shape[0]):
        x, z = _reference_forward(x, u_seq[t], p)
        xs.append(x)
        zs.append(z)
    return jnp.stack(xs), jnp.stack(zs)


if __name__ == "__main__":
    layer_num = 14   # module default
    batch = 2
    T = 8

    key = jax.random.PRNGKey(0)
    ks = jax.random.split(key, 13)
    scale = 0.1  # keep the linear recursion contractive so T-step values stay O(1)

    # Deterministic synthetic parameters (shapes from __init__, dim_num=1).
    params = {
        "u":    scale * jax.random.normal(ks[0], (1, layer_num), jnp.float32),
        "k1_w": scale * jax.random.normal(ks[1], (layer_num, layer_num), jnp.float32),
        "k2_w": scale * jax.random.normal(ks[2], (layer_num, layer_num), jnp.float32),
        "k5_w": scale * jax.random.normal(ks[3], (layer_num, layer_num), jnp.float32),
        "w":    scale * jax.random.normal(ks[4], (layer_num,), jnp.float32),
        "k7_w": scale * jax.random.normal(ks[5], (layer_num, layer_num), jnp.float32),
        "h1_w": scale * jax.random.normal(ks[6], (layer_num, layer_num), jnp.float32),
        "h1_b": scale * jax.random.normal(ks[7], (layer_num,), jnp.float32),
        "h4_w": scale * jax.random.normal(ks[8], (layer_num, layer_num), jnp.float32),
        "h4_b": scale * jax.random.normal(ks[9], (layer_num,), jnp.float32),
        # NOTE: k3/k4/k6/k8/h3 buffers are unused in forward() for dim_num=1.
    }

    x_t_1 = jax.random.normal(ks[10], (batch, 2 * layer_num), jnp.float32)
    u_t_0 = jax.random.normal(ks[11], (batch, layer_num), jnp.float32)
    u_seq = jax.random.normal(ks[12], (T, batch, layer_num), jnp.float32)

    # One-time parameter packing (cached across calls).
    prepared = prepare_params(params)
    jax.block_until_ready(prepared)

    # --- single module-equivalent forward step ---
    x_t, z_t = kalman_filter_estimator_forward(x_t_1, u_t_0, prepared)
    jax.block_until_ready((x_t, z_t))
    x_ref, z_ref = _reference_forward(x_t_1, u_t_0, params)
    assert x_t.shape == (batch, 2 * layer_num) and z_t.shape == (batch, 2 * layer_num)
    assert jnp.allclose(x_t, x_ref, atol=1e-4, rtol=1e-4)
    assert jnp.allclose(z_t, z_ref, atol=1e-4, rtol=1e-4)

    # --- T steps fused into ONE pallas_call (resident weights, VMEM-carried state) ---
    xs, zs = kalman_filter_estimator_scan(x_t_1, u_seq, prepared)
    jax.block_until_ready((xs, zs))
    xs_ref, zs_ref = _reference_scan(x_t_1, u_seq, params)
    assert xs.shape == (T, batch, 2 * layer_num) and zs.shape == (T, batch, 2 * layer_num)
    assert jnp.allclose(xs, xs_ref, atol=1e-4, rtol=1e-4)
    assert jnp.allclose(zs, zs_ref, atol=1e-4, rtol=1e-4)

    print("KERNEL_OK")
</pallas_src>

<mosaic_0001>
module attributes {stable_mosaic.version = 11 : i64} {
  func.func @_kf_scan_kernel(%arg0: i32, %arg1: memref<2x28xf32, #tpu.memory_space<vmem>>, %arg2: memref<1x2x14xf32, #tpu.memory_space<vmem>>, %arg3: memref<14x128xf32, #tpu.memory_space<vmem>>, %arg4: memref<256x128xf32, #tpu.memory_space<vmem>>, %arg5: memref<1x2x128xf32, #tpu.memory_space<vmem>>, %arg6: memref<1x2x128xf32, #tpu.memory_space<vmem>>, %arg7: memref<2x128xf32, #tpu.memory_space<vmem>>) attributes {dimension_semantics = [#tpu.dimension_semantics<arbitrary>], iteration_bounds = array<i64: 1>, scalar_prefetch = 0 : i64, scratch_operands = 1 : i64, tpu.core_type = #tpu.core_type<tc>, window_params = [{pipeline_mode = #tpu.pipeline_mode<synchronous>, transform_indices = @transform_0, window_bounds = array<i64: 2, 28>}, {transform_indices = @transform_1, window_bounds = array<i64: 1, 2, 14>}, {pipeline_mode = #tpu.pipeline_mode<synchronous>, transform_indices = @transform_2, window_bounds = array<i64: 14, 128>}, {pipeline_mode = #tpu.pipeline_mode<synchronous>, transform_indices = @transform_3, window_bounds = array<i64: 256, 128>}, {transform_indices = @transform_4, window_bounds = array<i64: 1, 2, 128>}, {transform_indices = @transform_5, window_bounds = array<i64: 1, 2, 128>}]} {
    %c0_i32 = arith.constant 0 : i32
    %0 = arith.cmpi eq, %arg0, %c0_i32 : i32
    %1 = arith.extui %0 : i1 to i32
    %c0_i32_0 = arith.constant 0 : i32
    %2 = arith.cmpi ne, %1, %c0_i32_0 : i32
    scf.if %2 {
      %c0_20 = arith.constant 0 : index
      %c0_21 = arith.constant 0 : index
      %20 = vector.load %arg1[%c0_20, %c0_21] : memref<2x28xf32, #tpu.memory_space<vmem>>, vector<2x28xf32>
      %cst_22 = arith.constant 0.000000e+00 : f32
      %21 = vector.broadcast %cst_22 : f32 to vector<2x99xf32>
      %cst_23 = arith.constant 1.000000e+00 : f32
      %22 = vector.broadcast %cst_23 : f32 to vector<2x1xf32>
      %23 = tpu.concatenate %20, %21, %22 in 1 : vector<2x28xf32>, vector<2x99xf32>, vector<2x1xf32> -> vector<2x128xf32>
      %c0_24 = arith.constant 0 : index
      %c0_25 = arith.constant 0 : index
      %24 = vector.load %arg7[%c0_24, %c0_25] : memref<2x128xf32, #tpu.memory_space<vmem>>, vector<2x128xf32>
      tpu.vector_store %arg7[%c0_24, %c0_25], %23 {strides = array<i32>} : memref<2x128xf32, #tpu.memory_space<vmem>>, vector<2x128xf32>,
    } else {
    }
    %c0 = arith.constant 0 : index
    %c0_1 = arith.constant 0 : index
    %3 = vector.load %arg4[%c0, %c0_1] : memref<256x128xf32, #tpu.memory_space<vmem>>, vector<128x128xf32>
    %c128 = arith.constant 128 : index
    %c0_2 = arith.constant 0 : index
    %4 = vector.load %arg4[%c128, %c0_2] : memref<256x128xf32, #tpu.memory_space<vmem>>, vector<128x128xf32>
    %c0_3 = arith.constant 0 : index
    %c0_4 = arith.constant 0 : index
    %5 = vector.load %arg7[%c0_3, %c0_4] : memref<2x128xf32, #tpu.memory_space<vmem>>, vector<2x128xf32>
    %cst = arith.constant dense<0.000000e+00> : vector<2x128xf32>
    %6 = tpu.matmul %5, %3, %cst {dimension_numbers = #tpu.dot_dimension_numbers<[1], [0], [0], [1], [0, 0, 1, 1], [], []>} : vector<2x128xf32>, vector<128x128xf32>, vector<2x128xf32> -> vector<2x128xf32>
    %c0_5 = arith.constant 0 : index
    %c0_6 = arith.constant 0 : index
    %c0_7 = arith.constant 0 : index
    %7 = vector.load %arg2[%c0_5, %c0_6, %c0_7] : memref<1x2x14xf32, #tpu.memory_space<vmem>>, vector<1x2x14xf32>
    %8 = vector.shape_cast %7 : vector<1x2x14xf32> to vector<2x14xf32>
    %c0_8 = arith.constant 0 : index
    %c0_9 = arith.constant 0 : index
    %9 = vector.load %arg3[%c0_8, %c0_9] : memref<14x128xf32, #tpu.memory_space<vmem>>, vector<14x128xf32>
    %cst_10 = arith.constant dense<0.000000e+00> : vector<2x128xf32>
    %10 = tpu.matmul %8, %9, %cst_10 {dimension_numbers = #tpu.dot_dimension_numbers<[1], [0], [0], [1], [0, 0, 1, 1], [], []>} : vector<2x14xf32>, vector<14x128xf32>, vector<2x128xf32> -> vector<2x128xf32>
    %11 = arith.addf %6, %10 : vector<2x128xf32>
    %cst_11 = arith.constant dense<0.000000e+00> : vector<2x128xf32>
    %12 = tpu.matmul %11, %4, %cst_11 {dimension_numbers = #tpu.dot_dimension_numbers<[1], [0], [0], [1], [0, 0, 1, 1], [], []>} : vector<2x128xf32>, vector<128x128xf32>, vector<2x128xf32> -> vector<2x128xf32>
    %c0_12 = arith.constant 0 : index
    %c0_13 = arith.constant 0 : index
    %13 = vector.load %arg7[%c0_12, %c0_13] : memref<2x128xf32, #tpu.memory_space<vmem>>, vector<2x128xf32>
    tpu.vector_store %arg7[%c0_12, %c0_13], %11 {strides = array<i32>} : memref<2x128xf32, #tpu.memory_space<vmem>>, vector<2x128xf32>,
    %c0_14 = arith.constant 0 : index
    %c0_15 = arith.constant 0 : index
    %c0_16 = arith.constant 0 : index
    %14 = vector.load %arg5[%c0_14, %c0_15, %c0_16] : memref<1x2x128xf32, #tpu.memory_space<vmem>>, vector<1x2x128xf32>
    %15 = vector.shape_cast %14 : vector<1x2x128xf32> to vector<2x128xf32>
    %16 = vector.shape_cast %11 : vector<2x128xf32> to vector<1x2x128xf32>
    tpu.vector_store %arg5[%c0_14, %c0_15, %c0_16], %16 {strides = array<i32>} : memref<1x2x128xf32, #tpu.memory_space<vmem>>, vector<1x2x128xf32>,
    %c0_17 = arith.constant 0 : index
    %c0_18 = arith.constant 0 : index
    %c0_19 = arith.constant 0 : index
    %17 = vector.load %arg6[%c0_17, %c0_18, %c0_19] : memref<1x2x128xf32, #tpu.memory_space<vmem>>, vector<1x2x128xf32>
    %18 = vector.shape_cast %17 : vector<1x2x128xf32> to vector<2x128xf32>
    %19 = vector.shape_cast %12 : vector<2x128xf32> to vector<1x2x128xf32>
    tpu.vector_store %arg6[%c0_17, %c0_18, %c0_19], %19 {strides = array<i32>} : memref<1x2x128xf32, #tpu.memory_space<vmem>>, vector<1x2x128xf32>,
    return
  }
  func.func @transform_0(%arg0: i32) -> (i32, i32) {
    %c0_i32 = arith.constant 0 : i32
    %c0_i32_0 = arith.constant 0 : i32
    %c0_i32_1 = arith.constant 0 : i32
    return %c0_i32, %c0_i32_0 : i32, i32
  }
  func.func @transform_1(%arg0: i32) -> (i32, i32, i32) {
    %c0_i32 = arith.constant 0 : i32
    %c0_i32_0 = arith.constant 0 : i32
    %c0_i32_1 = arith.constant 0 : i32
    return %arg0, %c0_i32, %c0_i32_0 : i32, i32, i32
  }
  func.func @transform_2(%arg0: i32) -> (i32, i32) {
    %c0_i32 = arith.constant 0 : i32
    %c0_i32_0 = arith.constant 0 : i32
    %c0_i32_1 = arith.constant 0 : i32
    return %c0_i32, %c0_i32_0 : i32, i32
  }
  func.func @transform_3(%arg0: i32) -> (i32, i32) {
    %c0_i32 = arith.constant 0 : i32
    %c0_i32_0 = arith.constant 0 : i32
    %c0_i32_1 = arith.constant 0 : i32
    return %c0_i32, %c0_i32_0 : i32, i32
  }
  func.func @transform_4(%arg0: i32) -> (i32, i32, i32) {
    %c0_i32 = arith.constant 0 : i32
    %c0_i32_0 = arith.constant 0 : i32
    %c0_i32_1 = arith.constant 0 : i32
    return %arg0, %c0_i32, %c0_i32_0 : i32, i32, i32
  }
  func.func @transform_5(%arg0: i32) -> (i32, i32, i32) {
    %c0_i32 = arith.constant 0 : i32
    %c0_i32_0 = arith.constant 0 : i32
    %c0_i32_1 = arith.constant 0 : i32
    return %arg0, %c0_i32, %c0_i32_0 : i32, i32, i32
  }
}

</mosaic_0001>

<bundles_post_ra>
// kernel: tpu_custom_call.1
= control target key start
LH: loop header
LB: loop body
LE: loop exit
PB: predicated region body
PF: predicated region fallthrough
CT: control target
= control target key end

     0   :  { %11 = vsyncpa [#allocation4], 0  ;;  %s786_s0 = inlined_call_operand.hbm [shape: f32[2,28], index: 0, kind: input, shape index: {}]   ;;  %s787_s1 = inlined_call_operand.vmem [shape: f32[1,2,14], index: 1, kind: input, shape index: {}]   ;;  %s788_s2 = inlined_call_operand.hbm [shape: f32[14,128], index: 2, kind: input, shape index: {}]   ;;  %s789_s3 = inlined_call_operand.hbm [shape: f32[256,128], index: 3, kind: input, shape index: {}]   ;;  %s790_s4 = inlined_call_operand.hbm [shape: f32[1,2,128], index: 4, kind: output, shape index: {0}]   ;;  %s791_s5 = inlined_call_operand.hbm [shape: f32[1,2,128], index: 5, kind: output, shape index: {1}]  }
   0x1   :  { %12 = vsyncpa [#allocation7], 0 }
   0x2   :  { %13 = vsyncpa [#allocation5], 0 }
   0x3   :  { %14 = vsyncpa [#allocation11], 0  ;;  %s656_s18 = smov [#allocation6]   ;;  %s538_s22 = scalar_lea.hbm %s788_s2, 256 }
   0x4   :  { %s32_s19 = sshll.u32 %s656_s18, 4  ;;  %p539_p0 = scmp.ne.s32.totalorder %s788_s2, %s538_s22  ;;  %s33_s19 = int_to_ptr.vmem [resolvable:$true] %s32_s19 }
   0x5   :  { %p542_p1 = scmp.lt.u32.totalorder %s538_s22, %s788_s2 }
   0x7   :  { %p544_p2 = pnand %p542_p1, %p539_p0 }
   0x9   :  { %547 = shalt.err (!%p544_p2)
}
   0xa   :  { %s548_s27 = scalar_lea.vmem %s33_s19, 256  ;;  %p553_p4 = scmp.lt.s32.totalorder %s33_s19, %s33_s19 }
   0xb   :  { %p549_p3 = scmp.ne.s32.totalorder %s33_s19, %s548_s27  ;;  %p554_p5 = scmp.lt.s32.totalorder %s548_s27, %s548_s27 }
   0xd   :  { %p555_p6 = por %p554_p5, %p553_p4 }
   0xf   :  { %p556_p7 = pnand %p555_p6, %p549_p3 }
  0x11   :  { %559 = shalt.err (!%p556_p7)
}
  0x12   :  { %s657_s28 = smov 128   ;;  %s658_s29 = smov 8  }
  0x13   :  { %38 = dma.hbm_to_vmem [thread:$0]  %s788_s2, 256, %s33_s19, [#allocation7], %s657_s28, %s657_s28, %s658_s29  }
  0x14   :  { %s659_s7 = smov [#allocation3]   ;;  %s660_s9 = smov [#allocation8]  }
  0x15   :  { %s21_s8 = sshll.u32 %s659_s7, 4  ;;  %s44_s10 = sshll.u32 %s660_s9, 4  ;;  %s22_s8 = int_to_ptr.vmem [resolvable:$true] %s21_s8  ;;  %s45_s10 = int_to_ptr.vmem [resolvable:$true] %s44_s10 }
  0x16   :  { %s560_s13 = scalar_lea.hbm %s786_s0, 32 }
  0x17   :  { %p561_p8 = scmp.ne.s32.totalorder %s786_s0, %s560_s13  ;;  %p564_p9 = scmp.lt.u32.totalorder %s560_s13, %s786_s0 }
  0x19   :  { %p566_p10 = pnand %p564_p9, %p561_p8 }
  0x1b   :  { %569 = shalt.err (!%p566_p10)
}
  0x1c   :  { %s570_s2 = scalar_lea.vmem %s22_s8, 32  ;;  %p575_p12 = scmp.lt.s32.totalorder %s22_s8, %s22_s8 }
  0x1d   :  { %p571_p11 = scmp.ne.s32.totalorder %s22_s8, %s570_s2  ;;  %p576_p13 = scmp.lt.s32.totalorder %s570_s2, %s570_s2 }
  0x1f   :  { %p577_p0 = por %p576_p13, %p575_p12 }
  0x21   :  { %p578_p1 = pnand %p577_p0, %p571_p11 }
  0x23   :  { %581 = shalt.err (!%p578_p1)
}
  0x24   :  { %24 = dma.hbm_to_vmem [thread:$0]  %s786_s0, 32, %s22_s8, [#allocation4]  }
  0x25   :  { %s582_s22 = scalar_lea.hbm %s789_s3, 4096 }
  0x26   :  { %p583_p2 = scmp.ne.s32.totalorder %s789_s3, %s582_s22  ;;  %p586_p3 = scmp.lt.u32.totalorder %s582_s22, %s789_s3 }
  0x28   :  { %p588_p4 = pnand %p586_p3, %p583_p2 }
  0x2a   :  { %591 = shalt.err (!%p588_p4)
}
  0x2b   :  { %s592_s27 = scalar_lea.vmem %s45_s10, 4096  ;;  %p597_p6 = scmp.lt.s32.totalorder %s45_s10, %s45_s10 }
  0x2c   :  { %p593_p5 = scmp.ne.s32.totalorder %s45_s10, %s592_s27  ;;  %p598_p7 = scmp.lt.s32.totalorder %s592_s27, %s592_s27 }
  0x2e   :  { %p599_p8 = por %p598_p7, %p597_p6 }
  0x30   :  { %p600_p9 = pnand %p599_p8, %p593_p5 }
  0x32   :  { %603 = shalt.err (!%p600_p9)
}
  0x33   :  { %50 = dma.hbm_to_vmem [thread:$0]  %s789_s3, 4096, %s45_s10, [#allocation7], %s657_s28, %s657_s28, %s658_s29  }
  0x34   :  { %648 = dma.done.wait [#allocation4], 32  }
  0x35   :  { %649 = vsyncadd [#allocation4], 4294967264 }
  0x36   :  { %650 = dma.done.wait [#allocation7], 4352  }
  0x37   :  { %651 = vsyncadd [#allocation7], 4294962944  ;;  %v661_v0 = vmov 0.0|0.0   ;;  %vm662_vm0 = vmmov 0   ;;  %v663_v1 = vmov 0.0   ;;  %vm110_vm1 = vcmask 1045504  }
  0x38   :  { %473 = vmatprep.subr.bf16.mxu0 %v661_v0  ;;  %501 = vmatprep.subr.bf16.mxu1 %v661_v0  ;;  %v104_v2 = vld [vmem:[#allocation6] sm:$0xff]  ;;  %v105_v3 = vld [vmem:[#allocation6 + $0x8] sm:$0x3f]  ;;  %vm664_vm2 = vmmov 1   ;;  %v70_v5 = vld [vmem:[#allocation8] sm:$0xff]  ;;  %vm106_vm4 = vcmask 113664  }
  0x39   :  { %400 = vmatprep.mubr.msk.f32.mxu0 %vm662_vm0, %v663_v1  ;;  %470 = vmatprep.mubr.msk.f32.mxu1 %vm662_vm0, %v663_v1  ;;  %vm475_vm3 = vmpackc.low %vm110_vm1, %vm664_vm2  ;;  %v474_v4 = vpack.c.bf16 %v105_v3, %v104_v2  ;;  %v71_v6 = vld [vmem:[#allocation8 + $0x8] sm:$0xff]  ;;  %v72_v9 = vld [vmem:[#allocation8 + $0x10] sm:$0xff]  ;;  %vm65_vm5 = vcmask 228352   ;;  %vm67_vm6 = vcmask 1039360  }
  0x3a   :  { %v103_v7 = vld [vmem:[%s787_s1] sm:$0x3]  ;;  %v478_v8 = vpack.c.bf16 %v71_v6, %v70_v5  ;;  %v73_v10 = vld [vmem:[#allocation8 + $0x18] sm:$0xff]  ;;  %v64_v11 = vld [vmem:[#allocation3] sm:$0x3]  ;;  %s665_s1 = smov [#allocation9]  }
  0x3b   :  { %476 = vmatpush3.bf16.msk.msra.mxu0 %vm475_vm3, %v474_v4  ;;  %v86_v12 = vld [vmem:[#allocation8 + $0x80] sm:$0xff]  ;;  %v481_v13 = vpack.c.bf16 %v73_v10, %v72_v9  ;;  %v66_v14 = vsel %vm65_vm5, %v64_v11, 0.0  ;;  %v87_v15 = vld [vmem:[#allocation8 + $0x88] sm:$0xff]  ;;  %v88_v16 = vld [vmem:[#allocation8 + $0x90] sm:$0xff]  ;;  %s333_s29 = sshll.u32 %s665_s1, 4  ;;  %s334_s29 = int_to_ptr.vmem [resolvable:$true] %s333_s29 }
  0x3c   :  { %477 = vmatprep.subr.bf16.mxu0 %v661_v0  ;;  %v89_v17 = vld [vmem:[#allocation8 + $0x98] sm:$0xff]  ;;  %v74_v18 = vld [vmem:[#allocation8 + $0x20] sm:$0xff]  ;;  %v75_v19 = vld [vmem:[#allocation8 + $0x28] sm:$0xff]  ;;  %v68_v20 = vsel %vm67_vm6, %v66_v14, 1.0  ;;  %v502_v21 = vpack.c.bf16 %v87_v15, %v86_v12  ;;  %s604_s6 = scalar_lea.vmem %s334_s29, 32  ;;  %p609_p11 = scmp.lt.s32.totalorder %s334_s29, %s334_s29 }
  0x3d   :  { %69 = vst [vmem:[#allocation2] sm:$0x3] %v68_v20  ;;  %v505_v22 = vpack.c.bf16 %v89_v17, %v88_v16  ;;  %v484_v23 = vpack.c.bf16 %v75_v19, %v74_v18  ;;  %v90_v24 = vld [vmem:[#allocation8 + $0xa0] sm:$0xff]  ;;  %v91_v25 = vld [vmem:[#allocation8 + $0xa8] sm:$0xff]  ;;  %v76_v26 = vld [vmem:[#allocation8 + $0x30] sm:$0xff]  ;;  %p605_p10 = scmp.ne.s32.totalorder %s334_s29, %s604_s6  ;;  %p610_p12 = scmp.lt.s32.totalorder %s604_s6, %s604_s6 }
  0x3e   :  { %401 = vmatmul.mubr.msk.f32.vlgmr.msra.gmra.mrb[0].mxu0 %vm106_vm4, %v103_v7  ;;  %503 = vmatpush3.bf16.msra.mxu1 %v502_v21  ;;  %v77_v27 = vld [vmem:[#allocation8 + $0x38] sm:$0xff]  ;;  %v508_v28 = vpack.c.bf16 %v91_v25, %v90_v24  ;;  %v92_v30 = vld [vmem:[#allocation8 + $0xb0] sm:$0xff]  ;;  %v78_v32 = vld [vmem:[#allocation8 + $0x40] sm:$0xff] }
  0x3f   :  { %479 = vmatpush3.bf16.msra.mxu0 %v478_v8  ;;  %435 = vmatprep.mubr.msk.f32.mxu0 %vm662_vm0, %v663_v1  ;;  %v487_v29 = vpack.c.bf16 %v77_v27, %v76_v26  ;;  %v93_v31 = vld [vmem:[#allocation8 + $0xb8] sm:$0xff]  ;;  %v79_v33 = vld [vmem:[#allocation8 + $0x48] sm:$0xff]  ;;  %v94_v36 = vld [vmem:[#allocation8 + $0xc0] sm:$0xff]  ;;  %p611_p13 = por %p610_p12, %p609_p11 }
  0x40   :  { %480 = vmatprep.subr.bf16.mxu0 %v661_v0  ;;  %504 = vmatprep.subr.bf16.mxu1 %v661_v0  ;;  %v511_v34 = vpack.c.bf16 %v93_v31, %v92_v30  ;;  %v490_v35 = vpack.c.bf16 %v79_v33, %v78_v32  ;;  %v95_v37 = vld [vmem:[#allocation8 + $0xc8] sm:$0xff]  ;;  %v80_v38 = vld [vmem:[#allocation8 + $0x50] sm:$0xff]  ;;  %v81_v39 = vld [vmem:[#allocation8 + $0x58] sm:$0xff] }
  0x41   :  { %v514_v40 = vpack.c.bf16 %v95_v37, %v94_v36  ;;  %v493_v41 = vpack.c.bf16 %v81_v39, %v80_v38  ;;  %v96_v42 = vld [vmem:[#allocation8 + $0xd0] sm:$0xff]  ;;  %v97_v43 = vld [vmem:[#allocation8 + $0xd8] sm:$0xff]  ;;  %v82_v44 = vld [vmem:[#allocation8 + $0x60] sm:$0xff]  ;;  %p612_p0 = pnand %p611_p13, %p605_p10 }
  0x42   :  { %506 = vmatpush3.bf16.msra.mxu1 %v505_v22  ;;  %v83_v45 = vld [vmem:[#allocation8 + $0x68] sm:$0xff]  ;;  %v517_v46 = vpack.c.bf16 %v97_v43, %v96_v42  ;;  %v98_v48 = vld [vmem:[#allocation8 + $0xe0] sm:$0xff]  ;;  %v84_v50 = vld [vmem:[#allocation8 + $0x70] sm:$0xff] }
  0x43   :  { %482 = vmatpush3.bf16.msra.mxu0 %v481_v13  ;;  %507 = vmatprep.subr.bf16.mxu1 %v661_v0  ;;  %v496_v47 = vpack.c.bf16 %v83_v45, %v82_v44  ;;  %v99_v49 = vld [vmem:[#allocation8 + $0xe8] sm:$0xff]  ;;  %v85_v51 = vld [vmem:[#allocation8 + $0x78] sm:$0xff]  ;;  %v100_v54 = vld [vmem:[#allocation8 + $0xf0] sm:$0xff] }
  0x44   :  { %483 = vmatprep.subr.bf16.mxu0 %v661_v0  ;;  %v520_v52 = vpack.c.bf16 %v99_v49, %v98_v48  ;;  %v499_v53 = vpack.c.bf16 %v85_v51, %v84_v50  ;;  %v101_v55 = vld [vmem:[#allocation8 + $0xf8] sm:$0xff]  ;;  %v102_v57 = vld [vmem:[#allocation2] sm:$0x3] }
  0x45   :  { %v523_v56 = vpack.c.bf16 %v101_v55, %v100_v54 }
  0x46   :  { %509 = vmatpush3.bf16.msra.mxu1 %v508_v28 }
  0x47   :  { %485 = vmatpush3.bf16.msra.mxu0 %v484_v23  ;;  %510 = vmatprep.subr.bf16.mxu1 %v661_v0 }
  0x48   :  { %486 = vmatprep.subr.bf16.mxu0 %v661_v0 }
  0x4a   :  { %512 = vmatpush3.bf16.msra.mxu1 %v511_v34 }
  0x4b   :  { %488 = vmatpush3.bf16.msra.mxu0 %v487_v29  ;;  %513 = vmatprep.subr.bf16.mxu1 %v661_v0 }
  0x4c   :  { %489 = vmatprep.subr.bf16.mxu0 %v661_v0 }
  0x4e   :  { %515 = vmatpush3.bf16.msra.mxu1 %v514_v40 }
  0x4f   :  { %491 = vmatpush3.bf16.msra.mxu0 %v490_v35  ;;  %516 = vmatprep.subr.bf16.mxu1 %v661_v0 }
  0x50   :  { %492 = vmatprep.subr.bf16.mxu0 %v661_v0 }
  0x52   :  { %518 = vmatpush3.bf16.msra.mxu1 %v517_v46 }
  0x53   :  { %494 = vmatpush3.bf16.msra.mxu0 %v493_v41  ;;  %519 = vmatprep.subr.bf16.mxu1 %v661_v0 }
  0x54   :  { %495 = vmatprep.subr.bf16.mxu0 %v661_v0 }
  0x56   :  { %521 = vmatpush3.bf16.msra.mxu1 %v520_v52 }
  0x57   :  { %497 = vmatpush3.bf16.msra.mxu0 %v496_v47  ;;  %522 = vmatprep.subr.bf16.mxu1 %v661_v0 }
  0x58   :  { %498 = vmatprep.subr.bf16.mxu0 %v661_v0 }
  0x5a   :  { %524 = vmatpush3.bf16.msra.mxu1 %v523_v56 }
  0x5b   :  { %500 = vmatpush3.bf16.msra.mxu0 %v499_v53 }
  0x5e   :  { %436 = vmatmul.mubr.f32.vlgmr.msra.gmra.mrb[0].mxu0 %v102_v57 }
 0x131   :  { %v250_v58 = vpop.f32.mrb[0].mxu0 }
 0x132   :  { %324 = vst [vmem:[#allocation2] sm:$0x3] %v250_v58  ;;  %325 = vst [vmem:[#allocation9] sm:$0x3] %v250_v58  ;;  %v437_v59 = vpop.f32.mrb[1].mxu0  ;;  %471 = vmatmul.mubr.f32.vlgmr.msra.gmra.mrb[0].mxu1 %v250_v58 }
 0x133   :  { %615 = shalt.err (!%p612_p0)
}
 0x134   :  { %s616_s9 = scalar_lea.hbm %s790_s4, 32 }
 0x135   :  { %p617_p1 = scmp.ne.s32.totalorder %s790_s4, %s616_s9  ;;  %p620_p2 = scmp.lt.u32.totalorder %s616_s9, %s790_s4 }
 0x137   :  { %p622_p3 = pnand %p620_p2, %p617_p1 }
 0x139   :  { %625 = shalt.err (!%p622_p3)
}
 0x13a   :  { %336 = dma.vmem_to_hbm [thread:$0]  %s334_s29, 32, %s790_s4, [#allocation5]  }
 0x13b   :  { %s666_s16 = smov [#allocation10]  }
 0x13c   :  { %s343_s17 = sshll.u32 %s666_s16, 4  ;;  %s344_s17 = int_to_ptr.vmem [resolvable:$true] %s343_s17 }
 0x13d   :  { %s626_s2 = scalar_lea.vmem %s344_s17, 32  ;;  %p631_p5 = scmp.lt.s32.totalorder %s344_s17, %s344_s17 }
 0x13e   :  { %p627_p4 = scmp.ne.s32.totalorder %s344_s17, %s626_s2  ;;  %p632_p6 = scmp.lt.s32.totalorder %s626_s2, %s626_s2 }
 0x140   :  { %p633_p7 = por %p632_p6, %p631_p5 }
 0x142   :  { %p634_p8 = pnand %p633_p7, %p627_p4 }
 0x205   :  { %v320_v60 = vpop.f32.mrb[0].mxu1 }
 0x206   :  { %326 = vst [vmem:[#allocation10] sm:$0x3] %v320_v60  ;;  %v472_v61 = vpop.f32.mrb[1].mxu1 }
 0x207   :  { %637 = shalt.err (!%p634_p8)
}
 0x208   :  { %s638_s20 = scalar_lea.hbm %s791_s5, 32 }
 0x209   :  { %p639_p9 = scmp.ne.s32.totalorder %s791_s5, %s638_s20  ;;  %p642_p10 = scmp.lt.u32.totalorder %s638_s20, %s791_s5 }
 0x20b   :  { %p644_p11 = pnand %p642_p10, %p639_p9 }
 0x20d   :  { %647 = shalt.err (!%p644_p11)
}
 0x20e   :  { %346 = dma.vmem_to_hbm [thread:$0]  %s344_s17, 32, %s791_s5, [#allocation11]  }
 0x20f   :  { %652 = dma.done.wait [#allocation5], 32  }
 0x210   :  { %653 = vsyncadd [#allocation5], 4294967264 }
 0x211   :  { %654 = dma.done.wait [#allocation11], 32  }
 0x212   :  { %655 = vsyncadd [#allocation11], 4294967264 }
 0x213   :  { %353 = vsyncpa [#allocation4], 1 }
 0x214   :  { %354 = vsyncpa [#allocation7], 1 }
 0x215   :  { %355 = vsyncpa [#allocation5], 1 }
 0x216   :  { %356 = vsyncpa [#allocation11], 1 }

</bundles_post_ra>
